<compile_context>
chip_gen: v7x
topology: tpu7x:2x2x1
jax: 0.10.0
libtpu: 0.0.40
codegen_flags: <defaults>
</compile_context>

<pallas_src>
import functools

import jax
import jax.numpy as jnp
from jax.experimental import pallas as pl
from jax.experimental.pallas import tpu as pltpu

_LANE = 128  # lane width the classifier head is padded to (lane-dense logits store)


# ---------------------------------------------------------------------------
# Fused kernel: ME mask -> conv3x3 (+bias, ReLU) -> global average pool -> FC.
# One grid step = one block of B_blk samples; all intermediates stay in VMEM/vregs.
# ---------------------------------------------------------------------------
def _menet_fused_kernel(x_ref, m_ref, vmask_ref, w_ref, fcw_ref, fcb_ref, o_ref,
                        *, w, s, b_blk):
    l = b_blk * s
    # ME preprocessing: random observation mask (int8 mask cast in-register, fused).
    xm = x_ref[0] * m_ref[0].astype(jnp.float32)                  # (C, L), lane-dense
    vm = vmask_ref[...]                                           # (9, L)

    # Build the 9 lane-rolled / boundary-masked taps, stack along sublanes, and do the
    # whole 3x3 conv as ONE (C_out, 9C+1) @ (9C+1, L) MXU dot (bias folded in as an
    # all-ones trailing row) instead of nine tiny K=4 accumulating dots.
    taps = []
    for kh in range(3):
        for kw in range(3):
            k = kh * 3 + kw
            d = (kh - 1) * w + (kw - 1)                           # flat source offset
            if d == 0:
                taps.append(xm)                                   # center tap: no mask needed
            else:
                # shifted[:, i] = xm[:, i + d]; out-of-image taps (including any roll
                # that wraps or crosses a sample boundary in the concatenated lane
                # layout) are zeroed by the precomputed boundary mask.
                taps.append(pltpu.roll(xm, (-d) % l, 1) * vm[k:k + 1, :])
    taps.append(jnp.ones((1, l), jnp.float32))                    # bias row
    stacked = jnp.concatenate(taps, axis=0)                       # (9C+1, L)

    feat = jnp.maximum(
        jnp.dot(w_ref[...], stacked, preferred_element_type=jnp.float32), 0.0)  # (C_out, L)

    # Per-sample GAP over its lane-aligned S-wide segment + 128-lane-padded FC head.
    fcw = fcw_ref[...]                                            # (C_out, 128)
    fcb = fcb_ref[...]                                            # (1, 128)
    inv_s = 1.0 / s
    rows = []
    for bi in range(b_blk):
        pooled = jnp.sum(feat[:, bi * s:(bi + 1) * s], axis=1, keepdims=True) * inv_s  # (C_out, 1)
        # Tiny proven epilogue (broadcast-mul + sublane reduce on a single vreg).
        rows.append(jnp.sum(fcw * pooled, axis=0, keepdims=True) + fcb)                # (1, 128)
    o_ref[0] = jnp.concatenate(rows, axis=0) if b_blk > 1 else rows[0]


# ---------------------------------------------------------------------------
# Wrapper: layout plumbing only (block packing / weight regrouping / lane padding).
# ---------------------------------------------------------------------------
def menet_forward(x_nchw, params, mask_nchw, *, block_batch=8):
    """ME-Net forward (masking stage + synthesized classifier) as one pallas_call."""
    n, c, h, w = x_nchw.shape
    s = h * w
    c_out = params["conv_w"].shape[0]
    num_classes = params["fc_w"].shape[0]
    assert params["conv_w"].shape == (c_out, c, 3, 3)
    assert num_classes <= _LANE

    # Batch blocking: B_blk samples per grid step; keep grid >= 2 so both v7x TCs get work.
    if n <= 1:
        b_blk = 1
    else:
        b_blk = max(1, min(block_batch, n // 2))
    n_blocks = pl.cdiv(n, b_blk)
    n_pad = n_blocks * b_blk
    l = b_blk * s

    # For scaled-up models: cast x (and w_taps) to bf16 here (keep f32 accumulation in-kernel).
    x_flat = x_nchw.reshape(n, c, s).astype(jnp.float32)
    m_flat = mask_nchw.reshape(n, c, s).astype(jnp.int8)          # exact 0/1 -> 4x less DMA
    if n_pad != n:
        x_flat = jnp.concatenate(
            [x_flat, jnp.zeros((n_pad - n, c, s), x_flat.dtype)], axis=0)
        m_flat = jnp.concatenate(
            [m_flat, jnp.zeros((n_pad - n, c, s), m_flat.dtype)], axis=0)
    # Pack each block of B_blk samples side by side along the lane axis: (NB, C, B_blk*S).
    x_blk = x_flat.reshape(n_blocks, b_blk, c, s).transpose(0, 2, 1, 3).reshape(n_blocks, c, l)
    m_blk = m_flat.reshape(n_blocks, b_blk, c, s).transpose(0, 2, 1, 3).reshape(n_blocks, c, l)

    # Per-tap boundary masks for the zero-padded ("same") 3x3 conv, tiled per sample: (9, L).
    row = jnp.arange(s, dtype=jnp.int32) // w
    col = jnp.arange(s, dtype=jnp.int32) % w
    vmask_s = jnp.stack(
        [((row + (kh - 1) >= 0) & (row + (kh - 1) < h) &
          (col + (kw - 1) >= 0) & (col + (kw - 1) < w)).astype(jnp.float32)
         for kh in range(3) for kw in range(3)],
        axis=0)                                                   # (9, S)
    vmask = jnp.tile(vmask_s, (1, b_blk))                         # (9, L)

    # Conv weights regrouped as one stacked-K matrix (c_out, 9*c) with tap-major columns
    # (column k*c + ci = conv_w[:, ci, kh, kw], k = kh*3 + kw), plus a bias column.
    w_taps = jnp.transpose(params["conv_w"], (2, 3, 1, 0)).reshape(9 * c, c_out)
    w_full = jnp.concatenate(
        [w_taps.T.astype(jnp.float32),
         params["conv_b"].reshape(c_out, 1).astype(jnp.float32)], axis=1)   # (c_out, 9c+1)

    # FC head transposed + zero-padded to 128 lanes (extra lanes sliced off below).
    fc_wt = jnp.zeros((c_out, _LANE), jnp.float32).at[:, :num_classes].set(
        params["fc_w"].T.astype(jnp.float32))
    fc_b = jnp.zeros((1, _LANE), jnp.float32).at[:, :num_classes].set(
        params["fc_b"].astype(jnp.float32))

    kernel = functools.partial(_menet_fused_kernel, w=w, s=s, b_blk=b_blk)

    out = pl.pallas_call(
        kernel,
        out_shape=jax.ShapeDtypeStruct((n_blocks, b_blk, _LANE), jnp.float32),
        grid=(n_blocks,),
        in_specs=[
            pl.BlockSpec((1, c, l), lambda i: (i, 0, 0)),         # x (per block of samples)
            pl.BlockSpec((1, c, l), lambda i: (i, 0, 0)),         # ME observation mask (int8)
            pl.BlockSpec((9, l), lambda i: (0, 0)),               # conv boundary masks (resident)
            pl.BlockSpec((c_out, 9 * c + 1), lambda i: (0, 0)),   # stacked conv taps + bias col
            pl.BlockSpec((c_out, _LANE), lambda i: (0, 0)),       # fc weight (lane-padded)
            pl.BlockSpec((1, _LANE), lambda i: (0, 0)),           # fc bias (lane-padded)
        ],
        out_specs=pl.BlockSpec((1, b_blk, _LANE), lambda i: (i, 0, 0)),
        compiler_params=pltpu.CompilerParams(
            dimension_semantics=("parallel",)),                   # lets v7x split the blocks
    )(x_blk, m_blk, vmask, w_full, fc_wt, fc_b)

    return out.reshape(n_pad, _LANE)[:n, :num_classes]


# ---------------------------------------------------------------------------
# Pure-JAX reference (correctness oracle) and parameter construction.
# ---------------------------------------------------------------------------
def _reference_forward(x_nchw, params, mask_nchw):
    xm = x_nchw * mask_nchw
    feat = jax.lax.conv_general_dilated(
        xm, params["conv_w"], window_strides=(1, 1), padding=((1, 1), (1, 1)),
        dimension_numbers=("NCHW", "OIHW", "NCHW"),
        precision=jax.lax.Precision.HIGHEST)
    feat = jnp.maximum(feat + params["conv_b"][None, :, None, None], 0.0)
    pooled = jnp.mean(feat, axis=(2, 3))
    return pooled @ params["fc_w"].T + params["fc_b"]


def init_params(key, c_in=4, c_out=8, num_classes=10):
    k1, k2, k3, k4 = jax.random.split(key, 4)
    return {
        "conv_w": 0.1 * jax.random.normal(k1, (c_out, c_in, 3, 3), jnp.float32),
        "conv_b": 0.05 * jax.random.normal(k2, (c_out,), jnp.float32),
        "fc_w": 0.1 * jax.random.normal(k3, (num_classes, c_out), jnp.float32),
        "fc_b": 0.05 * jax.random.normal(k4, (num_classes,), jnp.float32),
    }


if __name__ == "__main__":
    key = jax.random.PRNGKey(0)
    k_x, k_m, k_p, k_x2, k_m2 = jax.random.split(key, 5)

    # --- Check 1: module-sized input (N=2 -> B_blk=1, grid=2). ---
    N, C, H, W = 2, 4, 16, 16
    x = jax.random.normal(k_x, (N, C, H, W), jnp.float32)
    # ME-Net observation mask, keep probability p = 0.5 (deterministic given the key).
    mask = jax.random.bernoulli(k_m, p=0.5, shape=(N, C, H, W)).astype(jnp.float32)
    params = init_params(k_p, c_in=C)

    logits = jax.jit(menet_forward)(x, params, mask)
    jax.block_until_ready(logits)
    assert logits.shape == (N, 10) and logits.dtype == jnp.float32
    ref = _reference_forward(x, params, mask)
    assert bool(jnp.allclose(logits, ref, atol=2e-3, rtol=2e-3)), (
        f"max |diff| = {float(jnp.max(jnp.abs(logits - ref)))}")

    # --- Check 2: exercise the multi-sample block path (N=8 -> B_blk=4, grid=2). ---
    N2 = 8
    x2 = jax.random.normal(k_x2, (N2, C, H, W), jnp.float32)
    mask2 = jax.random.bernoulli(k_m2, p=0.5, shape=(N2, C, H, W)).astype(jnp.float32)
    logits2 = jax.jit(menet_forward)(x2, params, mask2)
    jax.block_until_ready(logits2)
    assert logits2.shape == (N2, 10)
    ref2 = _reference_forward(x2, params, mask2)
    assert bool(jnp.allclose(logits2, ref2, atol=2e-3, rtol=2e-3)), (
        f"max |diff| = {float(jnp.max(jnp.abs(logits2 - ref2)))}")

    print("KERNEL_OK")
</pallas_src>

<mosaic_0001>
module attributes {stable_mosaic.version = 11 : i64} {
  func.func @_menet_fused_kernel(%arg0: i32, %arg1: memref<1x4x256xf32, #tpu.memory_space<vmem>>, %arg2: memref<1x4x256xi8, #tpu.memory_space<vmem>>, %arg3: memref<9x256xf32, #tpu.memory_space<vmem>>, %arg4: memref<8x37xf32, #tpu.memory_space<vmem>>, %arg5: memref<8x128xf32, #tpu.memory_space<vmem>>, %arg6: memref<1x128xf32, #tpu.memory_space<vmem>>, %arg7: memref<1x1x128xf32, #tpu.memory_space<vmem>>) attributes {dimension_semantics = [#tpu.dimension_semantics<parallel>], iteration_bounds = array<i64: 2>, scalar_prefetch = 0 : i64, scratch_operands = 0 : i64, tpu.core_type = #tpu.core_type<tc>, window_params = [{transform_indices = @transform_0, window_bounds = array<i64: 1, 4, 256>}, {transform_indices = @transform_1, window_bounds = array<i64: 1, 4, 256>}, {pipeline_mode = #tpu.pipeline_mode<synchronous>, transform_indices = @transform_2, window_bounds = array<i64: 9, 256>}, {pipeline_mode = #tpu.pipeline_mode<synchronous>, transform_indices = @transform_3, window_bounds = array<i64: 8, 37>}, {pipeline_mode = #tpu.pipeline_mode<synchronous>, transform_indices = @transform_4, window_bounds = array<i64: 8, 128>}, {pipeline_mode = #tpu.pipeline_mode<synchronous>, transform_indices = @transform_5, window_bounds = array<i64: 1, 128>}, {transform_indices = @transform_6, window_bounds = array<i64: 1, 1, 128>}]} {
    %c0 = arith.constant 0 : index
    %c0_0 = arith.constant 0 : index
    %c0_1 = arith.constant 0 : index
    %0 = vector.load %arg1[%c0, %c0_0, %c0_1] : memref<1x4x256xf32, #tpu.memory_space<vmem>>, vector<1x4x256xf32>
    %1 = vector.shape_cast %0 : vector<1x4x256xf32> to vector<4x256xf32>
    %c0_2 = arith.constant 0 : index
    %c0_3 = arith.constant 0 : index
    %c0_4 = arith.constant 0 : index
    %2 = vector.load %arg2[%c0_2, %c0_3, %c0_4] : memref<1x4x256xi8, #tpu.memory_space<vmem>>, vector<1x4x256xi8>
    %3 = vector.shape_cast %2 : vector<1x4x256xi8> to vector<4x256xi8>
    %4 = arith.sitofp %3 : vector<4x256xi8> to vector<4x256xf32>
    %5 = arith.mulf %1, %4 : vector<4x256xf32>
    %c0_5 = arith.constant 0 : index
    %c0_6 = arith.constant 0 : index
    %6 = vector.load %arg3[%c0_5, %c0_6] : memref<9x256xf32, #tpu.memory_space<vmem>>, vector<9x256xf32>
    %c17_i32 = arith.constant 17 : i32
    %7 = tpu.dynamic_rotate %5 by %c17_i32 dim 1 : vector<4x256xf32>, i32 -> vector<4x256xf32>
    %8 = vector.extract_strided_slice %6 {offsets = [0, 0], sizes = [1, 256], strides = [1, 1]} : vector<9x256xf32> to vector<1x256xf32>
    %9 = vector.broadcast %8 : vector<1x256xf32> to vector<4x256xf32>
    %10 = arith.mulf %7, %9 : vector<4x256xf32>
    %c16_i32 = arith.constant 16 : i32
    %11 = tpu.dynamic_rotate %5 by %c16_i32 dim 1 : vector<4x256xf32>, i32 -> vector<4x256xf32>
    %12 = vector.extract_strided_slice %6 {offsets = [1, 0], sizes = [1, 256], strides = [1, 1]} : vector<9x256xf32> to vector<1x256xf32>
    %13 = vector.broadcast %12 : vector<1x256xf32> to vector<4x256xf32>
    %14 = arith.mulf %11, %13 : vector<4x256xf32>
    %c15_i32 = arith.constant 15 : i32
    %15 = tpu.dynamic_rotate %5 by %c15_i32 dim 1 : vector<4x256xf32>, i32 -> vector<4x256xf32>
    %16 = vector.extract_strided_slice %6 {offsets = [2, 0], sizes = [1, 256], strides = [1, 1]} : vector<9x256xf32> to vector<1x256xf32>
    %17 = vector.broadcast %16 : vector<1x256xf32> to vector<4x256xf32>
    %18 = arith.mulf %15, %17 : vector<4x256xf32>
    %c1_i32 = arith.constant 1 : i32
    %19 = tpu.dynamic_rotate %5 by %c1_i32 dim 1 : vector<4x256xf32>, i32 -> vector<4x256xf32>
    %20 = vector.extract_strided_slice %6 {offsets = [3, 0], sizes = [1, 256], strides = [1, 1]} : vector<9x256xf32> to vector<1x256xf32>
    %21 = vector.broadcast %20 : vector<1x256xf32> to vector<4x256xf32>
    %22 = arith.mulf %19, %21 : vector<4x256xf32>
    %c255_i32 = arith.constant 255 : i32
    %23 = tpu.dynamic_rotate %5 by %c255_i32 dim 1 : vector<4x256xf32>, i32 -> vector<4x256xf32>
    %24 = vector.extract_strided_slice %6 {offsets = [5, 0], sizes = [1, 256], strides = [1, 1]} : vector<9x256xf32> to vector<1x256xf32>
    %25 = vector.broadcast %24 : vector<1x256xf32> to vector<4x256xf32>
    %26 = arith.mulf %23, %25 : vector<4x256xf32>
    %c241_i32 = arith.constant 241 : i32
    %27 = tpu.dynamic_rotate %5 by %c241_i32 dim 1 : vector<4x256xf32>, i32 -> vector<4x256xf32>
    %28 = vector.extract_strided_slice %6 {offsets = [6, 0], sizes = [1, 256], strides = [1, 1]} : vector<9x256xf32> to vector<1x256xf32>
    %29 = vector.broadcast %28 : vector<1x256xf32> to vector<4x256xf32>
    %30 = arith.mulf %27, %29 : vector<4x256xf32>
    %c240_i32 = arith.constant 240 : i32
    %31 = tpu.dynamic_rotate %5 by %c240_i32 dim 1 : vector<4x256xf32>, i32 -> vector<4x256xf32>
    %32 = vector.extract_strided_slice %6 {offsets = [7, 0], sizes = [1, 256], strides = [1, 1]} : vector<9x256xf32> to vector<1x256xf32>
    %33 = vector.broadcast %32 : vector<1x256xf32> to vector<4x256xf32>
    %34 = arith.mulf %31, %33 : vector<4x256xf32>
    %c239_i32 = arith.constant 239 : i32
    %35 = tpu.dynamic_rotate %5 by %c239_i32 dim 1 : vector<4x256xf32>, i32 -> vector<4x256xf32>
    %36 = vector.extract_strided_slice %6 {offsets = [8, 0], sizes = [1, 256], strides = [1, 1]} : vector<9x256xf32> to vector<1x256xf32>
    %37 = vector.broadcast %36 : vector<1x256xf32> to vector<4x256xf32>
    %38 = arith.mulf %35, %37 : vector<4x256xf32>
    %cst = arith.constant 1.000000e+00 : f32
    %39 = vector.broadcast %cst : f32 to vector<1x256xf32>
    %40 = tpu.concatenate %10, %14, %18, %22, %5, %26, %30, %34, %38, %39 in 0 : vector<4x256xf32>, vector<4x256xf32>, vector<4x256xf32>, vector<4x256xf32>, vector<4x256xf32>, vector<4x256xf32>, vector<4x256xf32>, vector<4x256xf32>, vector<4x256xf32>, vector<1x256xf32> -> vector<37x256xf32>
    %c0_7 = arith.constant 0 : index
    %c0_8 = arith.constant 0 : index
    %41 = vector.load %arg4[%c0_7, %c0_8] : memref<8x37xf32, #tpu.memory_space<vmem>>, vector<8x37xf32>
    %cst_9 = arith.constant dense<0.000000e+00> : vector<8x256xf32>
    %42 = tpu.matmul %41, %40, %cst_9 {dimension_numbers = #tpu.dot_dimension_numbers<[1], [0], [0], [1], [0, 0, 1, 1], [], []>} : vector<8x37xf32>, vector<37x256xf32>, vector<8x256xf32> -> vector<8x256xf32>
    %cst_10 = arith.constant 0.000000e+00 : f32
    %43 = vector.broadcast %cst_10 : f32 to vector<8x256xf32>
    %44 = arith.maximumf %42, %43 : vector<8x256xf32>
    %c0_11 = arith.constant 0 : index
    %c0_12 = arith.constant 0 : index
    %45 = vector.load %arg5[%c0_11, %c0_12] : memref<8x128xf32, #tpu.memory_space<vmem>>, vector<8x128xf32>
    %c0_13 = arith.constant 0 : index
    %c0_14 = arith.constant 0 : index
    %46 = vector.load %arg6[%c0_13, %c0_14] : memref<1x128xf32, #tpu.memory_space<vmem>>, vector<1x128xf32>
    %cst_15 = arith.constant dense<0.000000e+00> : vector<8xf32>
    %47 = vector.multi_reduction <add>, %44, %cst_15 [1] : vector<8x256xf32> to vector<8xf32>
    %48 = vector.shape_cast %47 : vector<8xf32> to vector<8x1xf32>
    %cst_16 = arith.constant 3.906250e-03 : f32
    %49 = vector.broadcast %cst_16 : f32 to vector<8x1xf32>
    %50 = arith.mulf %48, %49 : vector<8x1xf32>
    %51 = vector.broadcast %50 : vector<8x1xf32> to vector<8x128xf32>
    %52 = arith.mulf %45, %51 : vector<8x128xf32>
    %cst_17 = arith.constant dense<0.000000e+00> : vector<128xf32>
    %53 = vector.multi_reduction <add>, %52, %cst_17 [0] : vector<8x128xf32> to vector<128xf32>
    %54 = vector.shape_cast %53 : vector<128xf32> to vector<1x128xf32>
    %55 = arith.addf %54, %46 : vector<1x128xf32>
    %c0_18 = arith.constant 0 : index
    %c0_19 = arith.constant 0 : index
    %c0_20 = arith.constant 0 : index
    %56 = vector.load %arg7[%c0_18, %c0_19, %c0_20] : memref<1x1x128xf32, #tpu.memory_space<vmem>>, vector<1x1x128xf32>
    %57 = vector.shape_cast %56 : vector<1x1x128xf32> to vector<1x128xf32>
    %58 = vector.shape_cast %55 : vector<1x128xf32> to vector<1x1x128xf32>
    tpu.vector_store %arg7[%c0_18, %c0_19, %c0_20], %58 {strides = array<i32>} : memref<1x1x128xf32, #tpu.memory_space<vmem>>, vector<1x1x128xf32>,
    return
  }
  func.func @transform_0(%arg0: i32) -> (i32, i32, i32) {
    %c0_i32 = arith.constant 0 : i32
    %c0_i32_0 = arith.constant 0 : i32
    %c0_i32_1 = arith.constant 0 : i32
    return %arg0, %c0_i32, %c0_i32_0 : i32, i32, i32
  }
  func.func @transform_1(%arg0: i32) -> (i32, i32, i32) {
    %c0_i32 = arith.constant 0 : i32
    %c0_i32_0 = arith.constant 0 : i32
    %c0_i32_1 = arith.constant 0 : i32
    return %arg0, %c0_i32, %c0_i32_0 : i32, i32, i32
  }
  func.func @transform_2(%arg0: i32) -> (i32, i32) {
    %c0_i32 = arith.constant 0 : i32
    %c0_i32_0 = arith.constant 0 : i32
    %c0_i32_1 = arith.constant 0 : i32
    return %c0_i32, %c0_i32_0 : i32, i32
  }
  func.func @transform_3(%arg0: i32) -> (i32, i32) {
    %c0_i32 = arith.constant 0 : i32
    %c0_i32_0 = arith.constant 0 : i32
    %c0_i32_1 = arith.constant 0 : i32
    return %c0_i32, %c0_i32_0 : i32, i32
  }
  func.func @transform_4(%arg0: i32) -> (i32, i32) {
    %c0_i32 = arith.constant 0 : i32
    %c0_i32_0 = arith.constant 0 : i32
    %c0_i32_1 = arith.constant 0 : i32
    return %c0_i32, %c0_i32_0 : i32, i32
  }
  func.func @transform_5(%arg0: i32) -> (i32, i32) {
    %c0_i32 = arith.constant 0 : i32
    %c0_i32_0 = arith.constant 0 : i32
    %c0_i32_1 = arith.constant 0 : i32
    return %c0_i32, %c0_i32_0 : i32, i32
  }
  func.func @transform_6(%arg0: i32) -> (i32, i32, i32) {
    %c0_i32 = arith.constant 0 : i32
    %c0_i32_0 = arith.constant 0 : i32
    %c0_i32_1 = arith.constant 0 : i32
    return %arg0, %c0_i32, %c0_i32_0 : i32, i32, i32
  }
}

</mosaic_0001>

<bundles_post_ra>
// kernel: menet_forward.1
= control target key start
LH: loop header
LB: loop body
LE: loop exit
PB: predicated region body
PF: predicated region fallthrough
CT: control target
= control target key end

     0   :  { %11 = vsyncpa [#allocation3], 0  ;;  %s1027_s0 = inlined_call_operand.vmem [shape: f32[2,4,256], index: 0, kind: input, shape index: {}]   ;;  %s1028_s1 = inlined_call_operand.vmem [shape: s8[2,4,256], index: 1, kind: input, shape index: {}]   ;;  %s1029_s2 = inlined_call_operand.vmem [shape: f32[9,256], index: 2, kind: input, shape index: {}]   ;;  %s1030_s3 = inlined_call_operand.vmem [shape: f32[8,37], index: 3, kind: input, shape index: {}]   ;;  %s1031_s4 = inlined_call_operand.vmem [shape: f32[8,128], index: 4, kind: input, shape index: {}]   ;;  %s1032_s5 = inlined_call_operand.vmem [shape: f32[1,128], index: 5, kind: input, shape index: {}]   ;;  %s1033_s6 = inlined_call_operand.hbm [shape: f32[2,1,128], index: 6, kind: output, shape index: {}]  }
   0x1   :  { %13 = vsyncpa [#allocation3 + $0x1], 0  ;;  %s812_s21 = smov 0   ;;  %s814_s22 = smov 0  }
   0x2   :  { %s816_s23 = smov 0   ;;  %s818_s24 = smov 0  }
   0x3 LB: > { %s833_s25 = sadd.s32 4294967295, %s765_s24   ;;  %s631_s26 = sadd.s32 4294967294, %s765_s24   ;;  %s765_s24 = sphi %s818_s24, %s1039_s24   ;;  %s761_s23 = sphi %s816_s23, %s1038_s23   ;;  %s757_s22 = sphi %s814_s22, %s1037_s22   ;;  %s753_s21 = sphi %s812_s21, %s1036_s21  }
   0x4   : > { %s837_s27 = sadd.s32 1, %s765_s24   ;;  %s162_s28 = sadd.s32 1, %s761_s23 }
   0x5   : > { %s159_s29 = ssub.s32 %s765_s24, %s837_s27  ;;  %p172_p0 = scmp.ne.s32.totalorder %s761_s23, %s757_s22 }
   0x6   : > { %p160_p1 = scmp.eq.s32.totalorder %s159_s29, 0  ;;  %p173_p2 = scmp.eq.s32.totalorder %s833_s25, 1 }
   0x7   : > { %p178_p3 = scmp.ne.s32.totalorder %s757_s22, %s753_s21  ;;  %p179_p4 = scmp.eq.s32.totalorder %s631_s26, 1 }
   0x8   : > { %s848_s30 = scalar_select %p160_p1, %s761_s23, %s162_s28  }
   0x9   : > { %p850_p5 = por %p173_p2, %p172_p0  ;;  %p854_p6 = por %p179_p4, %p178_p3 }
   0xa   : > { %p634_p7 = scmp.ge.s32.totalorder %s765_s24, 1  ;;  %p224_p8 = scmp.lt.s32.totalorder %s765_s24, 3 }
   0xc   : > { %p225_p9 = pnand %p634_p7, %p224_p8 }
   0xd   : > { %p257_p10 = scmp.lt.s32.totalorder (!%p225_p9), %s833_s25, 1  ;;  %s767_s18 = smov (!%p225_p9), 1   ;;  %v773_v6 = vmov (!%p225_p9), 0.0   ;;  %v282_v7 = vlaneseq (!%p225_p9)  ;;  %v898_v14 = vld [vmem:[%s1029_s2] sm:$0xff] (!%p225_p9)  ;;  %v903_v15 = vld [vmem:[%s1029_s2 + $0x8] sm:$0xff] (!%p225_p9)  ;;  %vm440_vm4 = vcmask (!%p225_p9), 1043456  }
   0xe   : > { %228 = sbr.rel (%p225_p9) target bundleno = 574 (0x23e), region = 44  ;;  %s768_s19 = smov (!%p225_p9), 16   ;;  %527 = vmatprep.mubr.f32.mxu0 (!%p225_p9), %v773_v6  ;;  %vm456_vm9 = vcmask (!%p225_p9), 1044480   ;;  %vm452_vm10 = vcmask (!%p225_p9), 302080  }
   0xf   : > { %s769_s20 = smov (!%p225_p9), 17   ;;  %s770_s26 = smov (!%p225_p9), 15   ;;  %v890_v8 = vshrl.u32 (!%p225_p9), %v282_v7, 7  ;;  %v892_v11 = vand.u32 (!%p225_p9), 127, %v282_v7 }
  0x10   : > { %s771_s28 = smov (!%p225_p9), 127   ;;  %s772_s29 = smov (!%p225_p9), 112  }
  0x11   : > { %v340_v12 = vsub.s32 (!%p225_p9), 3, %v890_v8  ;;  %v289_v17 = vsub.s32 (!%p225_p9), 0, %v890_v8  ;;  %vm335_vm0 = vcmp.lt.s32.totalorder (!%p225_p9), %v892_v11, 1  ;;  %v323_v18 = vsub.s32 (!%p225_p9), 2, %v890_v8 }
  0x12   : > { %v306_v19 = vsub.s32 (!%p225_p9), 1, %v890_v8  ;;  %vm284_vm1 = vcmp.lt.s32.totalorder (!%p225_p9), %v892_v11, 17  ;;  %v357_v27 = vsub.s32 (!%p225_p9), 5, %v890_v8  ;;  %vm318_vm2 = vcmp.lt.s32.totalorder (!%p225_p9), %v892_v11, 15 }
  0x13   : > { %v341_v20 = vrot.slane (!%p225_p9), %v898_v14, %v340_v12  ;;  %v345_v21 = vrot.slane (!%p225_p9), %v903_v15, %v340_v12  ;;  %v290_v25 = vrot.slane (!%p225_p9), %v898_v14, %v289_v17  ;;  %v294_v28 = vrot.slane (!%p225_p9), %v903_v15, %v289_v17 }
  0x14   : > { %v324_v29 = vrot.slane (!%p225_p9), %v898_v14, %v323_v18  ;;  %v328_v30 = vrot.slane (!%p225_p9), %v903_v15, %v323_v18  ;;  %vm301_vm3 = vcmp.lt.s32.totalorder (!%p225_p9), %v892_v11, 16  ;;  %v307_v31 = vrot.slane (!%p225_p9), %v898_v14, %v306_v19 }
  0x15   : > { %s258_s9 = scalar_select %p257_p10, %s833_s25, 1  ;;  %v311_v32 = vrot.slane %v903_v15, %v306_v19  ;;  %vm352_vm5 = vcmp.lt.s32.totalorder %v892_v11, 127  ;;  %v391_v35 = vsub.s32 7, %v890_v8  ;;  %v358_v40 = vrot.slane %v898_v14, %v357_v27 }
  0x16   : > { %v362_v41 = vrot.slane %v903_v15, %v357_v27  ;;  %vm386_vm6 = vcmp.lt.s32.totalorder %v892_v11, 112  ;;  %v374_v62 = vsub.s32 6, %v890_v8  ;;  %vm369_vm7 = vcmp.lt.s32.totalorder %v892_v11, 113 }
  0x17   : > { %s646_s10 = sshll.u32 %s258_s9, 3  ;;  %s637_s11 = sshll.u32 %s258_s9, 1  ;;  %v392_v52 = vrot.slane %v898_v14, %v391_v35  ;;  %v396_v61 = vrot.slane %v903_v15, %v391_v35  ;;  %vm403_vm8 = vcmp.lt.s32.totalorder %v892_v11, 111 }
  0x18   : > { %s261_s14 = scalar_lea.vmem %s1027_s0, %s646_s10  ;;  %s265_s17 = scalar_lea.vmem %s1028_s1, %s637_s11  ;;  %v375_v18 = vrot.slane %v898_v14, %v374_v62  ;;  %v379_v19 = vrot.slane %v903_v15, %v374_v62  ;;  %v639_v14 = vld [vmem:[%s1029_s2 + $0x18] ss:$0 sm:$0xff] }
  0x19   : > { %v267_v0 = vld [vmem:[%s265_s17] sm:$0x3]  ;;  %s774_s9 = smov 113   ;;  %s775_s10 = smov 111  }
  0x1a   : > { %v268_v1 = vunpack.c.0.s8 %v267_v0  ;;  %v266_v2 = vld [vmem:[%s261_s14] sm:$0xff]  ;;  %s643_s11 = sshll.u32 %s833_s25, 4  ;;  %s776_s25 = smov [#allocation2]  }
  0x1b   : > { %s985_s16 = scalar_lea.hbm %s1033_s6, %s643_s11 }
  0x1c   : > { %v269_v3 = vcvt.s32.f32 %v268_v1 }
  0x1e   : > { %v868_v4 = vmul.f32 %v269_v3, %v266_v2 }
  0x20   : > { %331 = vrot.lane.b32.xlu1 %v868_v4, %s767_s18  ;;  %297 = vrot.lane.b32.xlu0 %v868_v4, %s768_s19  ;;  %v874_v5 = vcombine.high %v868_v4, %v868_v4 }
  0x24   : > { %278 = vrot.lane.b32.xlu0 %v868_v4, %s769_s20  ;;  %333 = vrot.lane.b32.xlu1 %v874_v5, %s767_s18 }
  0x28   : > { %314 = vrot.lane.b32.xlu0 %v868_v4, %s770_s26  ;;  %280 = vrot.lane.b32.xlu1 %v874_v5, %s769_s20 }
  0x2c   : > { %316 = vrot.lane.b32.xlu1 %v874_v5, %s770_s26  ;;  %299 = vrot.lane.b32.xlu0 %v874_v5, %s768_s19  ;;  %s707_s19 = sshll.u32 %s776_s25, 4  ;;  %s708_s19 = int_to_ptr.vmem [resolvable:$false] %s707_s19 }
  0x2d   : > { %s709_s20 = scalar_lea.vmem %s708_s19, 32 }
  0x30   : > { %350 = vrot.lane.b32.xlu1 %v874_v5, %s771_s28  ;;  %348 = vrot.lane.b32.xlu0 %v868_v4, %s771_s28 }
  0x34   : > { %384 = vrot.lane.b32.xlu1 %v874_v5, %s772_s29  ;;  %382 = vrot.lane.b32.xlu0 %v868_v4, %s772_s29  ;;  %s255_s29 = sand.u32 1, %s757_s22  }
  0x35   : > { %s256_s12 = scalar_lea.vmem [#allocation2], %s255_s29  ;;  %s552_s17 = scalar_lea.sflag [#allocation3], %s255_s29 }
  0x36   : > { %s564_s13 = sshll.u32 %s256_s12, 4  ;;  %s987_s13 = int_to_ptr.vmem [resolvable:$true] %s564_s13 }
  0x37   : > { %s703_s18 = scalar_lea.vmem %s987_s13, 16  ;;  %p710_p0 = scmp.lt.s32.totalorder %s987_s13, %s708_s19 }
  0x38   : > { %367 = vrot.lane.b32.xlu1 %v874_v5, %s774_s9  ;;  %365 = vrot.lane.b32.xlu0 %v868_v4, %s774_s9  ;;  %p704_p11 = scmp.ne.s32.totalorder %s987_s13, %s703_s18  ;;  %p711_p1 = scmp.lt.s32.totalorder %s709_s20, %s703_s18 }
  0x3a   : > { %p705_p12 = pnand %p704_p11, %p850_p5  ;;  %p712_p2 = por %p711_p1, %p710_p0 }
  0x3c   : > { %401 = vrot.lane.b32.xlu1 %v874_v5, %s775_s10  ;;  %399 = vrot.lane.b32.xlu0 %v868_v4, %s775_s10  ;;  %p706_p13 = pneg %p705_p12 }
  0x3e   : > { %p713_p3 = pnand %p712_p2, %p706_p13 }
  0x92   : > { %v332_v9 = vpop.permute.xlu1 %331  ;;  %v298_v10 = vpop.permute.xlu0 %297 }
  0x96   : > { %v279_v13 = vpop.permute.xlu0 %278  ;;  %v334_v16 = vpop.permute.xlu1 %333 }
  0x97   : > { %v336_v22 = vsel %vm335_vm0, %v332_v9, %v334_v16  ;;  %v337_v23 = vsel %vm335_vm0, %v334_v16, %v332_v9 }
  0x98   : > { %v346_v33 = vmul.f32 %v341_v20, %v337_v23  ;;  %v347_v34 = vmul.f32 %v345_v21, %v336_v22 }
  0x9a   : > { %v315_v24 = vpop.permute.xlu0 %314  ;;  %v281_v26 = vpop.permute.xlu1 %280  ;;  %v424_v50 = vrot.slane %v346_v33, 4  ;;  %v425_v51 = vrot.slane %v347_v34, 4 }
  0x9b   : > { %v285_v36 = vsel %vm284_vm1, %v279_v13, %v281_v26  ;;  %v286_v37 = vsel %vm284_vm1, %v281_v26, %v279_v13 }
  0x9c   : > { %v295_v53 = vmul.f32 %v290_v25, %v286_v37  ;;  %v296_v54 = vmul.f32 %v294_v28, %v285_v36 }
  0x9e   : > { %v317_v38 = vpop.permute.xlu1 %316  ;;  %v300_v39 = vpop.permute.xlu0 %299 }
  0x9f   : > { %v319_v42 = vsel %vm318_vm2, %v315_v24, %v317_v38  ;;  %v320_v43 = vsel %vm318_vm2, %v317_v38, %v315_v24  ;;  %v302_v44 = vsel %vm301_vm3, %v298_v10, %v300_v39  ;;  %v303_v45 = vsel %vm301_vm3, %v300_v39, %v298_v10 }
  0xa0   : > { %v329_v46 = vmul.f32 %v324_v29, %v320_v43  ;;  %v330_v47 = vmul.f32 %v328_v30, %v319_v42  ;;  %v312_v48 = vmul.f32 %v307_v31, %v303_v45  ;;  %v313_v49 = vmul.f32 %v311_v32, %v302_v44  ;;  %v638_v30 = vld [vmem:[%s1029_s2 + $0x10] ss:$0 sm:$0xff] }
  0xa2   : > { %v418_v55 = vrot.slane %v312_v48, 4  ;;  %v419_v56 = vrot.slane %v313_v49, 4  ;;  %v351_v57 = vpop.permute.xlu1 %350  ;;  %v349_v58 = vpop.permute.xlu0 %348  ;;  %v444_v0 = vsel %vm440_vm4, %v330_v47, %v425_v51  ;;  %v443_v2 = vsel %vm440_vm4, %v329_v46, %v424_v50  ;;  %v536_v47 = vld [vmem:[%s1031_s4] sm:$0xff] }
  0xa3   : > { %v353_v59 = vsel %vm352_vm5, %v349_v58, %v351_v57  ;;  %v354_v60 = vsel %vm352_vm5, %v351_v57, %v349_v58 }
  0xa4   : > { %v442_v63 = vsel %vm440_vm4, %v296_v54, %v419_v56  ;;  %v441_v1 = vsel %vm440_vm4, %v295_v53, %v418_v55  ;;  %v363_v7 = vmul.f32 %v358_v40, %v353_v59  ;;  %v364_v9 = vmul.f32 %v362_v41, %v354_v60  ;;  %v537_v56 = vld [vmem:[%s1032_s5] sm:$0x1] }
  0xa5   : > { %v647_v3 = vpack.c.bf16 %v444_v0, %v442_v63  ;;  %v649_v6 = vpack.c.bf16 %v443_v2, %v441_v1 }
  0xa6   : > { %v385_v10 = vpop.permute.xlu1 %384  ;;  %v383_v12 = vpop.permute.xlu0 %382  ;;  %v430_v20 = vrot.slane %v363_v7, 4  ;;  %v431_v21 = vrot.slane %v364_v9, 4 }
  0xa7   : > { %v387_v13 = vsel %vm386_vm6, %v383_v12, %v385_v10  ;;  %v388_v8 = vsel %vm386_vm6, %v385_v10, %v383_v12  ;;  %648 = vmatprep.subr.bf16.mxu0 %v647_v3 }
  0xa8   : > { %v397_v16 = vmul.f32 %v392_v52, %v387_v13  ;;  %v398_v17 = vmul.f32 %v396_v61, %v388_v8  ;;  %650 = vmatpush1.bf16.msra.mxu0 %v649_v6  ;;  %v446_v32 = vsel %vm440_vm4, %v874_v5, %v431_v21  ;;  %v445_v11 = vsel %vm440_vm4, %v868_v4, %v430_v20  ;;  %v451_v4 = vld [vmem:[%s1030_s3] sm:$0xff] }
  0xaa   : > { %v368_v22 = vpop.permute.xlu1 %367  ;;  %v366_v23 = vpop.permute.xlu0 %365  ;;  %v436_v26 = vrot.slane %v397_v16, 4  ;;  %v437_v27 = vrot.slane %v398_v17, 4 }
  0xab   : > { %v370_v24 = vsel %vm369_vm7, %v366_v23, %v368_v22  ;;  %v371_v25 = vsel %vm369_vm7, %v368_v22, %v366_v23 }
  0xac   : > { %v380_v28 = vmul.f32 %v375_v18, %v370_v24  ;;  %v381_v29 = vmul.f32 %v379_v19, %v371_v25 }
  0xae   : > { %v402_v15 = vpop.permute.xlu1 %401  ;;  %v400_v31 = vpop.permute.xlu0 %399  ;;  %v448_v33 = vsel %vm440_vm4, %v381_v29, %v437_v27  ;;  %v447_v34 = vsel %vm440_vm4, %v380_v28, %v436_v26 }
  0xaf   : > { %v404_v35 = vsel %vm403_vm8, %v400_v31, %v402_v15  ;;  %v405_v36 = vsel %vm403_vm8, %v402_v15, %v400_v31  ;;  %v651_v37 = vpack.c.bf16 %v448_v33, %v446_v32  ;;  %v653_v38 = vpack.c.bf16 %v447_v34, %v445_v11 }
  0xb0   : > { %v414_v39 = vmul.f32 %v638_v30, %v404_v35  ;;  %v415_v40 = vmul.f32 %v639_v14, %v405_v36 }
  0xb1   : > { %652 = vmatprep.subr.bf16.mxu0 %v651_v37 }
  0xb2   : > { %654 = vmatpush1.bf16.msra.mxu0 %v653_v38  ;;  %v450_v41 = vsel %vm440_vm4, %v415_v40, 1.0  ;;  %v449_v5 = vsel %vm440_vm4, %v414_v39, 1.0 }
  0xb3   : > { %640 = vmatprep.subr.msk.mxu0 %vm456_vm9, %v450_v41 }
  0xb6   : > { %641 = vmatpush1.msk.msra.mxu0 %vm456_vm9, %v449_v5 }
  0xb7   : > { %642 = vmatmul.mubr.msk.f32.vlgmr.msra.gmra.mrb[0].mxu0 %vm452_vm10, %v451_v4 }
 0x18a   : > { %v529_v42 = vpop.f32.mrb[0].mxu0 }
 0x18b   : > { %v534_v43 = vmax.f32 %v529_v42, 0.0  ;;  %v531_v44 = vpop.f32.mrb[1].mxu0 }
 0x18c   : > { %v535_v45 = vmax.f32 %v531_v44, 0.0 }
 0x18e   : > { %v538_v46 = vadd.f32 %v535_v45, %v534_v43 }
 0x190   : > { %539 = vadd.xlane.f32.xlu0 %v538_v46 }
 0x21d   : > { %v540_v48 = vpop.xlane.xlu0 %539 }
 0x21e   : > { %v541_v49 = vmul.f32 0.00390625, %v540_v48 }
 0x220   : > { %v542_v50 = vmul.f32 %v541_v49, %v536_v47 }
 0x222   : > { %v543_v51 = vrot.slane %v542_v50, 4 }
 0x224   : > { %v544_v52 = vadd.f32 %v543_v51, %v542_v50 }
 0x226   : > { %v545_v53 = vrot.slane %v544_v52, 2 }
 0x228   : > { %v546_v54 = vadd.f32 %v545_v53, %v544_v52 }
 0x22a   : > { %v547_v55 = vrot.slane %v546_v54, 1 }
 0x22c   : > { %v548_v57 = vadd.f32 %v547_v55, %v546_v54 }
 0x22e   : > { %v549_v58 = vadd.f32 %v548_v57, %v537_v56 }
 0x230   : > { %550 = vst [vmem:[%s256_s12] sm:$0x1] %v549_v58 }
 0x231   : > { %716 = shalt.err (!%p713_p3)
}
 0x232   : > { %s717_s26 = scalar_lea.hbm %s985_s16, 16  ;;  %s721_s9 = scalar_lea.hbm %s1033_s6, 32 }
 0x233   : > { %p718_p4 = scmp.ne.s32.totalorder %s985_s16, %s717_s26  ;;  %p722_p9 = scmp.lt.u32.totalorder %s985_s16, %s1033_s6 }
 0x234   : > { %p723_p10 = scmp.lt.u32.totalorder %s721_s9, %s717_s26  ;;  %p725_p12 = scmp.lt.u32.totalorder %s717_s26, %s985_s16 }
 0x235   : > { %p719_p7 = pnand %p718_p4, %p850_p5 }
 0x236   : > { %p724_p11 = por %p723_p10, %p722_p9 }
 0x237   : > { %p720_p8 = pneg %p719_p7 }
 0x238   : > { %p726_p13 = por %p725_p12, %p724_p11 }
 0x23a   : > { %p727_p0 = pnand %p726_p13, %p720_p8 }
 0x23c   : > { %730 = shalt.err (!%p727_p0)
}
 0x23d   : > { %655 = dma.vmem_to_hbm [thread:$0]  (%p850_p5), %s987_s13, 16, %s985_s16, %s552_s17  }
 0x23e PF: > { %p661_p1 = scmp.ge.s32.totalorder %s765_s24, 2  ;;  %s576_s12 = sand.u32 1, %s753_s21  }
 0x23f   : > { %s577_s14 = scalar_lea.sflag [#allocation3], %s576_s12 }
 0x240   : > { %p658_p2 = pnand %p661_p1, %p854_p6 }
 0x242   : > { %748 = dma.done.wait (!%p658_p2), %s577_s14, 16  }
 0x243   : > { %750 = vsyncadd (!%p658_p2), %s577_s14, 4294967280  ;;  %p16_p3 = scmp.ge.s32.totalorder %s837_s27, 4   ;;  %s1036_s21 = smov %s757_s22 }
 0x244   : > { %s1037_s22 = smov %s761_s23  ;;  %s1038_s23 = smov %s848_s30 }
 0x245   : > { %s1039_s24 = smov %s837_s27  ;;  %18 = sbr.rel (!%p16_p3) target bundleno = 3 (0x3), region = 82 }
 0x24c   :  { %581 = vsyncpa [#allocation3], 1 }
 0x24d   :  { %583 = vsyncpa [#allocation3 + $0x1], 1 }

</bundles_post_ra>
